<compile_context>
chip_gen: v5e
topology: v5e:2x2
jax: 0.10.0
libtpu: 0.0.40
codegen_flags: <defaults>
</compile_context>

<pallas_src>
import jax
import jax.numpy as jnp
from jax.experimental import pallas as pl
from jax.experimental.pallas import tpu as pltpu


def _cdiv(a, b):
    return -(-a // b)


def _rmlp_kernel(x_ref, a_ref, bias_ref, o_ref):
    """One (TR, K) row-tile of the flat input -> one (TR, 128) tile of the
    final NCHW output for channel c = program_id(2).

    x_ref:    (TR, K)      flat NCHW rows, 128 whole C-groups per row.
    a_ref:    (C, K, 128)  VMEM-resident mix matrix (Linear weight,
                           de-interleave and torch.roll all folded in).
    bias_ref: (C,)         bias in SMEM (cheap scalar read).
    o_ref:    (TR, 128)    final-layout output tile (lane-dense, full stores).
    """
    c = pl.program_id(2)
    acc = jnp.dot(x_ref[...], a_ref[c], preferred_element_type=jnp.float32)
    o_ref[...] = (acc + bias_ref[c]).astype(o_ref.dtype)


def r_mlp_forward(x, weight, bias):
    """Reproduces R_MLP.forward for NCHW input x: (B, C, H, W) -> (B, C, H, W)."""
    B, C, H, W = x.shape
    if C > 8:
        # TODO(synk): for large C the (C, 128*C, 128) mix matrix no longer fits
        # comfortably in VMEM; a plain (M, C) @ (C, C) MXU kernel is the right
        # design there.
        raise NotImplementedError("r_mlp_forward fused path assumes C <= 8")

    HW = H * W
    K = 128 * C                        # lanes per input row = 128 whole C-groups

    # torch.roll(x, 1, dims=3) rotates every contiguous W-segment of the flat
    # buffer right by one.  When W-segments never straddle a row (K % W == 0,
    # incl. the trivial W == 1 case) the roll is folded into A as a row
    # permutation; otherwise one XLA pre-pass does it.
    fold_roll = (K % W == 0)
    if not fold_roll:
        # TODO(synk): fold the roll for K % W != 0 as well (needs a one-lane
        # halo from the neighbouring row); one extra XLA pass for now.
        x = jnp.roll(x, 1, axis=3)

    # ---- constant (C, K, 128) mix matrix: Linear + de-interleave (+ roll) ----
    # A[c, q, j] = weight[c, dst(q) % C] if dst(q)//C == j else 0, where dst(q)
    # is the (rolled) group-slot input lane q feeds.  Input-independent, tiny
    # (C^2 * 64 KiB), built once from the (C, C) weight.
    q = jnp.arange(K, dtype=jnp.int32)
    if fold_roll:
        dst = jnp.where((q + 1) % W == 0, q + 1 - W, q + 1)
    else:
        dst = q
    j = jnp.arange(128, dtype=jnp.int32)
    sel = (dst[:, None] // C == j[None, :]).astype(x.dtype)             # (K, 128)
    amat = weight.astype(x.dtype)[:, dst % C][:, :, None] * sel[None]   # (C, K, 128)
    bias = bias.astype(jnp.float32)

    # ---- row tiling of the per-batch flat buffer -----------------------------
    R0 = _cdiv(C * HW, K)                      # rows actually needed per batch
    TR_cap = max(8, (1 << 20) // (4 * K))      # ~1 MiB input row-tile
    T = _cdiv(R0, TR_cap)                      # row tiles per batch
    TR = _cdiv(_cdiv(R0, T), 8) * 8            # rows per tile, sublane aligned
    R = T * TR                                 # padded rows per batch
    pad = R * K - C * HW

    xb = x.reshape(B, C * HW)                  # flat NCHW per batch (free view)
    if pad:
        xb = jnp.pad(xb, ((0, 0), (0, pad)))   # zero-pad; garbage lanes sliced off
    x2 = xb.reshape(B * R, K)

    out2 = pl.pallas_call(
        _rmlp_kernel,
        out_shape=jax.ShapeDtypeStruct((B * C * R, 128), x.dtype),
        grid_spec=pltpu.PrefetchScalarGridSpec(
            num_scalar_prefetch=0,
            grid=(B, T, C),                    # c innermost: input tile reused
            in_specs=[
                # streamed activation rows (read exactly once)
                pl.BlockSpec((TR, K), lambda b, t, c: (b * T + t, 0)),
                # VMEM-resident mix matrix (constant block index -> one DMA)
                pl.BlockSpec((C, K, 128), lambda b, t, c: (0, 0, 0)),
                # bias scalars in SMEM
                pl.BlockSpec(memory_space=pltpu.MemorySpace.SMEM),
            ],
            # scatter each (TR, 128) tile straight into the final NCHW layout
            out_specs=pl.BlockSpec(
                (TR, 128), lambda b, t, c: ((b * C + c) * T + t, 0)),
        ),
        compiler_params=pltpu.CompilerParams(
            dimension_semantics=("parallel", "parallel", "arbitrary")),
    )(x2, amat, bias)

    out = out2.reshape(B, C, R * 128)
    if R * 128 != HW:                          # only when HW % 1024 != 0
        out = out[:, :, :HW]
    return out.reshape(B, C, H, W)


def init_params(in_channels, key):
    """Deterministic init mimicking nn.Linear default (uniform +/- 1/sqrt(C))."""
    k_w, k_b = jax.random.split(key)
    bound = 1.0 / jnp.sqrt(jnp.float32(in_channels))
    weight = jax.random.uniform(
        k_w, (in_channels, in_channels), jnp.float32, -bound, bound)
    bias = jax.random.uniform(
        k_b, (in_channels,), jnp.float32, -bound, bound)
    return weight, bias


if __name__ == "__main__":
    key = jax.random.PRNGKey(0)
    k_x, k_p = jax.random.split(key)

    B, C, H, W = 2, 4, 16, 16                  # img_size = 16, in_channels = 4
    x = jax.random.normal(k_x, (B, C, H, W), jnp.float32)
    weight, bias = init_params(C, k_p)

    out = jax.jit(r_mlp_forward)(x, weight, bias)
    out = jax.block_until_ready(out)

    # Pure-JAX reference replicating the PyTorch module with exact f32
    # elementwise math (no matmul rounding).
    rolled = jnp.roll(x, 1, axis=3)
    flat = rolled.reshape(B * H * W, C)
    ref = (flat[:, None, :] * weight[None, :, :]).sum(-1) + bias
    ref = ref.reshape(B, H, W, C).transpose(0, 3, 1, 2)

    assert out.shape == (B, C, H, W)
    err = float(jnp.max(jnp.abs(out - ref)))
    # The kernel's f32 matmul may use MXU default precision (bf16 operand
    # rounding) -> up to a few e-2 absolute error on O(1) values; a roll /
    # de-interleave logic bug would show up as O(1) mismatches instead.
    assert err < 5e-2, err
    print("KERNEL_OK")
</pallas_src>

<mosaic_0001>
module attributes {stable_mosaic.version = 11 : i64} {
  func.func @_rmlp_kernel(%arg0: i32, %arg1: i32, %arg2: i32, %arg3: memref<8x512xf32, #tpu.memory_space<vmem>>, %arg4: memref<4x512x128xf32, #tpu.memory_space<vmem>>, %arg5: memref<4xf32, #tpu.memory_space<smem>>, %arg6: memref<8x128xf32, #tpu.memory_space<vmem>>) attributes {dimension_semantics = [#tpu.dimension_semantics<parallel>, #tpu.dimension_semantics<parallel>, #tpu.dimension_semantics<arbitrary>], iteration_bounds = array<i64: 2, 1, 4>, scalar_prefetch = 0 : i64, scratch_operands = 0 : i64, tpu.core_type = #tpu.core_type<tc>, window_params = [{transform_indices = @transform_0, window_bounds = array<i64: 8, 512>}, {pipeline_mode = #tpu.pipeline_mode<synchronous>, transform_indices = @transform_1, window_bounds = array<i64: 4, 512, 128>}, {transform_indices = @transform_2, window_bounds = array<i64: 4>}, {transform_indices = @transform_3, window_bounds = array<i64: 8, 128>}]} {
    %c0 = arith.constant 0 : index
    %c0_0 = arith.constant 0 : index
    %0 = vector.load %arg3[%c0, %c0_0] : memref<8x512xf32, #tpu.memory_space<vmem>>, vector<8x512xf32>
    %1 = arith.index_cast %arg2 : i32 to index
    %c0_1 = arith.constant 0 : index
    %c0_2 = arith.constant 0 : index
    %2 = vector.load %arg4[%1, %c0_1, %c0_2] : memref<4x512x128xf32, #tpu.memory_space<vmem>>, vector<1x512x128xf32>
    %3 = vector.shape_cast %2 : vector<1x512x128xf32> to vector<512x128xf32>
    %cst = arith.constant dense<0.000000e+00> : vector<8x128xf32>
    %4 = tpu.matmul %0, %3, %cst {dimension_numbers = #tpu.dot_dimension_numbers<[1], [0], [0], [1], [0, 0, 1, 1], [], []>} : vector<8x512xf32>, vector<512x128xf32>, vector<8x128xf32> -> vector<8x128xf32>
    %5 = arith.index_cast %arg2 : i32 to index
    %6 = memref.load %arg5[%5] : memref<4xf32, #tpu.memory_space<smem>>
    %7 = vector.broadcast %6 : f32 to vector<8x128xf32>
    %8 = arith.addf %4, %7 : vector<8x128xf32>
    %c0_3 = arith.constant 0 : index
    %c0_4 = arith.constant 0 : index
    %9 = vector.load %arg6[%c0_3, %c0_4] : memref<8x128xf32, #tpu.memory_space<vmem>>, vector<8x128xf32>
    tpu.vector_store %arg6[%c0_3, %c0_4], %8 {strides = array<i32>} : memref<8x128xf32, #tpu.memory_space<vmem>>, vector<8x128xf32>,
    return
  }
  func.func @transform_0(%arg0: i32, %arg1: i32, %arg2: i32) -> (i32, i32) {
    %c1_i32 = arith.constant 1 : i32
    %0 = arith.muli %arg0, %c1_i32 : i32
    %1 = arith.addi %0, %arg1 : i32
    %c0_i32 = arith.constant 0 : i32
    %c0_i32_0 = arith.constant 0 : i32
    return %1, %c0_i32 : i32, i32
  }
  func.func @transform_1(%arg0: i32, %arg1: i32, %arg2: i32) -> (i32, i32, i32) {
    %c0_i32 = arith.constant 0 : i32
    %c0_i32_0 = arith.constant 0 : i32
    %c0_i32_1 = arith.constant 0 : i32
    %c0_i32_2 = arith.constant 0 : i32
    return %c0_i32, %c0_i32_0, %c0_i32_1 : i32, i32, i32
  }
  func.func @transform_2(%arg0: i32, %arg1: i32, %arg2: i32) -> i32 {
    %c0_i32 = arith.constant 0 : i32
    %c0_i32_0 = arith.constant 0 : i32
    return %c0_i32 : i32
  }
  func.func @transform_3(%arg0: i32, %arg1: i32, %arg2: i32) -> (i32, i32) {
    %c4_i32 = arith.constant 4 : i32
    %0 = arith.muli %arg0, %c4_i32 : i32
    %1 = arith.addi %0, %arg2 : i32
    %c1_i32 = arith.constant 1 : i32
    %2 = arith.muli %1, %c1_i32 : i32
    %3 = arith.addi %2, %arg1 : i32
    %c0_i32 = arith.constant 0 : i32
    %c0_i32_0 = arith.constant 0 : i32
    return %3, %c0_i32 : i32, i32
  }
}

</mosaic_0001>

<bundles_post_ra>
// kernel: r_mlp_forward.1
= control target key start
LH: loop header
LB: loop body
LE: loop exit
PB: predicated region body
PF: predicated region fallthrough
CT: control target
= control target key end

     0   :  { %8 = vsyncpa [#allocation3], 0  ;;  %s616_s12 = smov 0   ;;  %s618_s13 = smov 0   ;;  %s755_s0 = inlined_call_operand.vmem [shape: f32[16,512], index: 0, kind: input, shape index: {}]   ;;  %s756_s1 = inlined_call_operand.vmem [shape: f32[4,512,128], index: 1, kind: input, shape index: {}]   ;;  %s757_s2 = inlined_call_operand.vmem [shape: f32[4], index: 2, kind: input, shape index: {}]   ;;  %s758_s3 = inlined_call_operand.vmem [shape: f32[64,128], index: 3, kind: output, shape index: {}]  }
   0x1   :  { %s620_s14 = smov 0   ;;  %s622_s15 = smov 0  }
   0x2   :  { %s624_s16 = smov 0  }
   0x3 LB: > { %s468_s17 = sadd.s32 4294967295, %s593_s16   ;;  %s26_s18 = sadd.s32 1, %s585_s14  ;;  %s593_s16 = sphi %s624_s16, %s14_s16   ;;  %s589_s15 = sphi %s622_s15, %s762_s15   ;;  %s585_s14 = sphi %s620_s14, %s761_s14   ;;  %s581_s13 = sphi %s618_s13, %s760_s13   ;;  %s577_s12 = sphi %s616_s12, %s759_s12  }
   0x4   : > { %p27_p0 = scmp.ge.s32.totalorder %s26_s18, 4  ;;  %s33_s19 = sadd.s32 1, %s589_s15 }
   0x5   : > { %p472_p1 = scmp.ge.s32.totalorder %s593_s16, 1  ;;  %p140_p2 = scmp.lt.s32.totalorder %s593_s16, 9 }
   0x6   : > { %s764_s18 = smov (%p27_p0, %s26_s18), 0  ;;  %s766_s19 = smov (!%p27_p0, %s33_s19), %s589_s15 }
   0x7   : > { %p141_p3 = pnand %p472_p1, %p140_p2  ;;  %p35_p4 = scmp.ge.s32.totalorder %s766_s19, 2 }
   0x8   : > { %p493_p5 = scmp.eq.s32.totalorder %s468_s17, 0  ;;  %s155_s22 = sshll.u32 %s757_s2, 4  ;;  %s156_s22 = int_to_ptr.vmem [resolvable:$true] %s155_s22 }
   0x9   : > { %p489_p6 = pneg %p141_p3  ;;  %s768_s19 = smov (%p35_p4, %s766_s19), 0 }
   0xa   : > { %s595_s23 = smov [#allocation2]   ;;  %178 = sbr.rel (%p141_p3) target bundleno = 190 (0xbe), region = 32 }
   0xb   : > { %p490_p7 = pnand %p493_p5, %p489_p6 }
   0xd   : > { %492 = dma.vmem_to_smem (!%p490_p7), %s156_s22, 16, %s595_s23, [#allocation3]  }
   0xf   : > { %572 = dma.done.wait (%p493_p5), [#allocation3], 16  }
  0x10   : > { %574 = vsyncadd (%p493_p5), [#allocation3], 4294967280 }
  0x11   : > { %185 = sfence }
  0x12   : > { %s481_s24 = sshll.u32 %s577_s12, 9  ;;  %p208_p8 = scmp.lt.s32.totalorder %s581_s13, 1 }
  0x13   : > { %s658_s27 = scalar_lea.vmem %s756_s1, %s481_s24  ;;  %s294_s6 = sld [smem:[#allocation2 + %s577_s12]] }
  0x14   : > { %v277_v0 = vld [vmem:[%s658_s27 + $0x178] sm:$0xff]  ;;  %v276_v2 = vld [vmem:[%s658_s27 + $0x170] sm:$0xff]  ;;  %v275_v6 = vld [vmem:[%s658_s27 + $0x168] sm:$0xff]  ;;  %s708_s28 = scalar_select %p208_p8, %s581_s13, 1 }
  0x15   : > { %v245_v1 = vld [vmem:[%s658_s27 + $0x78] sm:$0xff]  ;;  %336 = vmatpush.msra.mxu2 %v277_v0  ;;  %v244_v4 = vld [vmem:[%s658_s27 + $0x70] sm:$0xff]  ;;  %v243_v8 = vld [vmem:[%s658_s27 + $0x68] sm:$0xff]  ;;  %s479_s7 = sshll.u32 %s581_s13, 2 }
  0x16   : > { %296 = vmatpush.msra.mxu0 %v245_v1  ;;  %v293_v3 = vld [vmem:[%s658_s27 + $0x1f8] sm:$0xff]  ;;  %v292_v7 = vld [vmem:[%s658_s27 + $0x1f0] sm:$0xff]  ;;  %v291_v10 = vld [vmem:[%s658_s27 + $0x1e8] sm:$0xff]  ;;  %s484_s29 = sshll.u32 %s708_s28, 5  ;;  %s215_s8 = sadd.s32 %s577_s12, %s479_s7 }
  0x17   : > { %v261_v5 = vld [vmem:[%s658_s27 + $0xf8] sm:$0xff]  ;;  %356 = vmatpush.msra.mxu3 %v293_v3  ;;  %337 = vmatpush.msra.mxu2 %v276_v2  ;;  %v260_v9 = vld [vmem:[%s658_s27 + $0xf0] sm:$0xff]  ;;  %v274_v11 = vld [vmem:[%s658_s27 + $0x160] sm:$0xff]  ;;  %s212_s5 = scalar_lea.vmem %s755_s0, %s484_s29  ;;  %p217_p9 = scmp.lt.s32.totalorder %s215_s8, 7 }
  0x18   : > { %316 = vmatpush.msra.mxu1 %v261_v5  ;;  %297 = vmatpush.msra.mxu0 %v244_v4  ;;  %v242_v12 = vld [vmem:[%s658_s27 + $0x60] sm:$0xff]  ;;  %v259_v13 = vld [vmem:[%s658_s27 + $0xe8] sm:$0xff]  ;;  %v273_v16 = vld [vmem:[%s658_s27 + $0x158] sm:$0xff] }
  0x19   : > { %357 = vmatpush.msra.mxu3 %v292_v7  ;;  %338 = vmatpush.msra.mxu2 %v275_v6  ;;  %v290_v14 = vld [vmem:[%s658_s27 + $0x1e0] sm:$0xff]  ;;  %v241_v17 = vld [vmem:[%s658_s27 + $0x58] sm:$0xff]  ;;  %v272_v20 = vld [vmem:[%s658_s27 + $0x150] sm:$0xff]  ;;  %v295_v4 = vstv %s294_s6  ;;  %s770_s8 = smov (!%p217_p9, %s215_s8), 7 }
  0x1a   : > { %317 = vmatpush.msra.mxu1 %v260_v9  ;;  %298 = vmatpush.msra.mxu0 %v243_v8  ;;  %v258_v15 = vld [vmem:[%s658_s27 + $0xe0] sm:$0xff]  ;;  %v289_v18 = vld [vmem:[%s658_s27 + $0x1d8] sm:$0xff]  ;;  %v240_v21 = vld [vmem:[%s658_s27 + $0x50] sm:$0xff]  ;;  %s480_s9 = sshll.u32 %s770_s8, 3 }
  0x1b   : > { %358 = vmatpush.msra.mxu3 %v291_v10  ;;  %339 = vmatpush.msra.mxu2 %v274_v11  ;;  %v257_v19 = vld [vmem:[%s658_s27 + $0xd8] sm:$0xff]  ;;  %v288_v22 = vld [vmem:[%s658_s27 + $0x1d0] sm:$0xff]  ;;  %v271_v24 = vld [vmem:[%s658_s27 + $0x148] sm:$0xff]  ;;  %s220_s17 = scalar_lea.vmem %s758_s3, %s480_s9 }
  0x1c   : > { %318 = vmatpush.msra.mxu1 %v259_v13  ;;  %299 = vmatpush.msra.mxu0 %v242_v12  ;;  %v256_v23 = vld [vmem:[%s658_s27 + $0xd0] sm:$0xff]  ;;  %v239_v25 = vld [vmem:[%s658_s27 + $0x48] sm:$0xff]  ;;  %v270_v28 = vld [vmem:[%s658_s27 + $0x140] sm:$0xff] }
  0x1d   : > { %359 = vmatpush.msra.mxu3 %v290_v14  ;;  %340 = vmatpush.msra.mxu2 %v273_v16  ;;  %v287_v26 = vld [vmem:[%s658_s27 + $0x1c8] sm:$0xff]  ;;  %v238_v29 = vld [vmem:[%s658_s27 + $0x40] sm:$0xff]  ;;  %v269_v32 = vld [vmem:[%s658_s27 + $0x138] sm:$0xff] }
  0x1e   : > { %319 = vmatpush.msra.mxu1 %v258_v15  ;;  %300 = vmatpush.msra.mxu0 %v241_v17  ;;  %v255_v27 = vld [vmem:[%s658_s27 + $0xc8] sm:$0xff]  ;;  %v286_v30 = vld [vmem:[%s658_s27 + $0x1c0] sm:$0xff]  ;;  %v237_v33 = vld [vmem:[%s658_s27 + $0x38] sm:$0xff] }
  0x1f   : > { %360 = vmatpush.msra.mxu3 %v289_v18  ;;  %341 = vmatpush.msra.mxu2 %v272_v20  ;;  %v254_v31 = vld [vmem:[%s658_s27 + $0xc0] sm:$0xff]  ;;  %v285_v34 = vld [vmem:[%s658_s27 + $0x1b8] sm:$0xff]  ;;  %v268_v36 = vld [vmem:[%s658_s27 + $0x130] sm:$0xff] }
  0x20   : > { %320 = vmatpush.msra.mxu1 %v257_v19  ;;  %301 = vmatpush.msra.mxu0 %v240_v21  ;;  %v253_v35 = vld [vmem:[%s658_s27 + $0xb8] sm:$0xff]  ;;  %v236_v37 = vld [vmem:[%s658_s27 + $0x30] sm:$0xff]  ;;  %v267_v40 = vld [vmem:[%s658_s27 + $0x128] sm:$0xff] }
  0x21   : > { %361 = vmatpush.msra.mxu3 %v288_v22  ;;  %342 = vmatpush.msra.mxu2 %v271_v24  ;;  %v284_v38 = vld [vmem:[%s658_s27 + $0x1b0] sm:$0xff]  ;;  %v235_v41 = vld [vmem:[%s658_s27 + $0x28] sm:$0xff]  ;;  %v266_v44 = vld [vmem:[%s658_s27 + $0x120] sm:$0xff] }
  0x22   : > { %321 = vmatpush.msra.mxu1 %v256_v23  ;;  %302 = vmatpush.msra.mxu0 %v239_v25  ;;  %v252_v39 = vld [vmem:[%s658_s27 + $0xb0] sm:$0xff]  ;;  %v283_v42 = vld [vmem:[%s658_s27 + $0x1a8] sm:$0xff]  ;;  %v234_v45 = vld [vmem:[%s658_s27 + $0x20] sm:$0xff] }
  0x23   : > { %362 = vmatpush.msra.mxu3 %v287_v26  ;;  %343 = vmatpush.msra.mxu2 %v270_v28  ;;  %v251_v43 = vld [vmem:[%s658_s27 + $0xa8] sm:$0xff]  ;;  %v282_v46 = vld [vmem:[%s658_s27 + $0x1a0] sm:$0xff]  ;;  %v265_v48 = vld [vmem:[%s658_s27 + $0x118] sm:$0xff] }
  0x24   : > { %322 = vmatpush.msra.mxu1 %v255_v27  ;;  %303 = vmatpush.msra.mxu0 %v238_v29  ;;  %v250_v47 = vld [vmem:[%s658_s27 + $0xa0] sm:$0xff]  ;;  %v233_v49 = vld [vmem:[%s658_s27 + $0x18] sm:$0xff]  ;;  %v264_v52 = vld [vmem:[%s658_s27 + $0x110] sm:$0xff] }
  0x25   : > { %363 = vmatpush.msra.mxu3 %v286_v30  ;;  %344 = vmatpush.msra.mxu2 %v269_v32  ;;  %v281_v50 = vld [vmem:[%s658_s27 + $0x198] sm:$0xff]  ;;  %v232_v53 = vld [vmem:[%s658_s27 + $0x10] sm:$0xff]  ;;  %v263_v56 = vld [vmem:[%s658_s27 + $0x108] sm:$0xff] }
  0x26   : > { %323 = vmatpush.msra.mxu1 %v254_v31  ;;  %304 = vmatpush.msra.mxu0 %v237_v33  ;;  %v249_v51 = vld [vmem:[%s658_s27 + $0x98] sm:$0xff]  ;;  %v280_v54 = vld [vmem:[%s658_s27 + $0x190] sm:$0xff]  ;;  %v231_v57 = vld [vmem:[%s658_s27 + $0x8] sm:$0xff] }
  0x27   : > { %364 = vmatpush.msra.mxu3 %v285_v34  ;;  %345 = vmatpush.msra.mxu2 %v268_v36  ;;  %v248_v55 = vld [vmem:[%s658_s27 + $0x90] sm:$0xff]  ;;  %v279_v58 = vld [vmem:[%s658_s27 + $0x188] sm:$0xff]  ;;  %v262_v60 = vld [vmem:[%s658_s27 + $0x100] sm:$0xff] }
  0x28   : > { %324 = vmatpush.msra.mxu1 %v253_v35  ;;  %305 = vmatpush.msra.mxu0 %v236_v37  ;;  %v247_v59 = vld [vmem:[%s658_s27 + $0x88] sm:$0xff]  ;;  %v230_v61 = vld [vmem:[%s658_s27] sm:$0xff]  ;;  %v226_v62 = vld [vmem:[%s212_s5 + $0x10] sm:$0xff] }
  0x29   : > { %365 = vmatpush.msra.mxu3 %v284_v38  ;;  %346 = vmatpush.msra.mxu2 %v267_v40  ;;  %v278_v63 = vld [vmem:[%s658_s27 + $0x180] sm:$0xff]  ;;  %v227_v1 = vld [vmem:[%s212_s5 + $0x18] sm:$0xff]  ;;  %v225_v3 = vld [vmem:[%s212_s5 + $0x8] sm:$0xff] }
  0x2a   : > { %325 = vmatpush.msra.mxu1 %v252_v39  ;;  %306 = vmatpush.msra.mxu0 %v235_v41  ;;  %v224_v0 = vld [vmem:[%s212_s5] sm:$0xff] }
  0x2b   : > { %366 = vmatpush.msra.mxu3 %v283_v42  ;;  %347 = vmatpush.msra.mxu2 %v266_v44  ;;  %v246_v2 = vld [vmem:[%s658_s27 + $0x80] sm:$0xff] }
  0x2c   : > { %326 = vmatpush.msra.mxu1 %v251_v43  ;;  %307 = vmatpush.msra.mxu0 %v234_v45 }
  0x2d   : > { %367 = vmatpush.msra.mxu3 %v282_v46  ;;  %348 = vmatpush.msra.mxu2 %v265_v48 }
  0x2e   : > { %327 = vmatpush.msra.mxu1 %v250_v47  ;;  %308 = vmatpush.msra.mxu0 %v233_v49 }
  0x2f   : > { %368 = vmatpush.msra.mxu3 %v281_v50  ;;  %349 = vmatpush.msra.mxu2 %v264_v52 }
  0x30   : > { %328 = vmatpush.msra.mxu1 %v249_v51  ;;  %309 = vmatpush.msra.mxu0 %v232_v53 }
  0x31   : > { %369 = vmatpush.msra.mxu3 %v280_v54  ;;  %350 = vmatpush.msra.mxu2 %v263_v56 }
  0x32   : > { %329 = vmatpush.msra.mxu1 %v248_v55  ;;  %310 = vmatpush.msra.mxu0 %v231_v57 }
  0x33   : > { %370 = vmatpush.msra.mxu3 %v279_v58  ;;  %351 = vmatpush.msra.mxu2 %v262_v60 }
  0x34   : > { %330 = vmatpush.msra.mxu1 %v247_v59  ;;  %311 = vmatpush.msra.mxu0 %v230_v61 }
  0x35   : > { %352 = vmatmul.f32.vlgmr.msra.gmra.mxu2 %v226_v62  ;;  %371 = vmatpush.msra.mxu3 %v278_v63 }
  0x36   : > { %312 = vmatmul.f32.vlgmr.msra.gmra.mxu0 %v224_v0  ;;  %372 = vmatmul.f32.vlgmr.msra.gmra.mxu3 %v227_v1 }
  0x37   : > { %331 = vmatpush.msra.mxu1 %v246_v2 }
  0x38   : > { %332 = vmatmul.f32.vlgmr.msra.gmra.mxu1 %v225_v3 }
  0xb3   : > { %v313_v5 = vpop.f32.mrf.mxu0 }
  0xb4   : > { %v314_v6 = vadd.f32 %v313_v5, %v295_v4 }
  0xb5   : > { %v333_v7 = vpop.f32.mrf.mxu1 }
  0xb6   : > { %v334_v8 = vadd.f32 %v333_v7, %v314_v6 }
  0xb8   : > { %v353_v9 = vpop.f32.mrf.mxu2 }
  0xb9   : > { %v354_v10 = vadd.f32 %v353_v9, %v334_v8  ;;  %v373_v11 = vpop.f32.mrf.mxu3 }
  0xbb   : > { %v374_v12 = vadd.f32 %v373_v11, %v354_v10 }
  0xbd   : > { %376 = vst [vmem:[%s220_s17] sm:$0xff] %v374_v12 }
  0xbe PF: > { %s14_s16 = sadd.s32 1, %s593_s16   ;;  %s759_s12 = smov %s585_s14 }
  0xbf   : > { %p11_p10 = scmp.ge.s32.totalorder %s14_s16, 10   ;;  %s760_s13 = smov %s589_s15 }
  0xc0   : > { %s761_s14 = smov %s764_s18  ;;  %s762_s15 = smov %s768_s19 }
  0xc1   :  { %13 = sbr.rel (!%p11_p10) target bundleno = 3 (0x3), region = 68 }
  0xc6   :  { %405 = vsyncpa [#allocation3], 1 }
  0xc7   :  { %407 = vsyncpa [#allocation3 + $0x1], 1 }

</bundles_post_ra>
